<compile_context>
chip_gen: v5e
topology: v5e:2x2
jax: 0.10.0
libtpu: 0.0.40
codegen_flags: <defaults>
</compile_context>

<pallas_src>
import jax
import jax.numpy as jnp
from jax import lax
from jax.experimental import pallas as pl
from jax.experimental.pallas import tpu as pltpu


def _round_up(a: int, b: int) -> int:
    return (a + b - 1) // b * b


def _cdiv(a: int, b: int) -> int:
    return -(-a // b)


def hybrid_embed_kernel(p_ref, wc_ref, bc_ref, wp_ref, bp_ref, o_ref, feat_ref):
    # Conv (im2col matmul) + bias + ReLU: computed once per row tile (j == 0)
    # into a bf16 VMEM scratch, reused across all E tiles of that row tile.
    @pl.when(pl.program_id(1) == 0)
    def _():
        f = jnp.dot(p_ref[...], wc_ref[...], preferred_element_type=jnp.float32)
        feat_ref[...] = jnp.maximum(f + bc_ref[...], 0.0).astype(feat_ref.dtype)

    # Projection (nn.Linear): feat @ Wp + bp, bf16 MXU operands / f32 acc.
    out = jnp.dot(feat_ref[...], wp_ref[...], preferred_element_type=jnp.float32)
    o_ref[...] = (out + bp_ref[...]).astype(o_ref.dtype)


def hybrid_embed(x, conv_w, conv_b, proj_w, proj_b, *, k, tm_max=4096):
    """x: (B, C, H, W) NCHW; conv_w: (F, C, k, k); conv_b: (F,);
    proj_w: (E, F) (PyTorch nn.Linear layout); proj_b: (E,).
    Returns (B, Hf*Wf, E) in x.dtype."""
    B, C, H, W = x.shape
    assert H % k == 0 and W % k == 0
    Hf, Wf = H // k, W // k
    F = conv_w.shape[0]
    E = proj_w.shape[0]
    N = Hf * Wf
    M = B * N
    Ckk = C * k * k
    out_dtype = x.dtype
    out_bytes = jnp.dtype(out_dtype).itemsize

    # --- glue (plain JAX): bf16 cast BEFORE the patchify transpose ------------
    # TODO(synk): a fully in-kernel im2col (grid over B with a (1, C, H, W)
    # block, reorder (C,Hf,k,Wf,k)->(Hf*Wf,Ckk) in VMEM) would remove this
    # remaining HBM transpose pass entirely.
    patches = (x.astype(jnp.bfloat16)
                .reshape(B, C, Hf, k, Wf, k)
                .transpose(0, 2, 4, 1, 3, 5)
                .reshape(M, Ckk))                         # (M, Ckk) bf16, unpadded
    wc = conv_w.reshape(F, Ckk).T                         # (Ckk, F)
    wp = proj_w.T                                         # (F, E)

    # --- lane padding policy ---------------------------------------------------
    F_p = _round_up(F, 128)
    if F_p % 256 != 0 and _round_up(F, 256) - F <= F // 8:
        F_p = _round_up(F, 256)        # feed the full 256-wide MXU (v6e/v7x)
    E_p128 = _round_up(E, 128)
    if E % 128 == 0:
        E_out = E                      # already lane-dense: no pad, no slice
    elif E_p128 - E <= max(E // 8, 8):
        E_out = E_p128                 # cheap pad -> unmasked stores (slice later)
    else:
        E_out = E                      # skip the write waste; accept masked stores

    # --- per-chip VMEM budget & tile selection ---------------------------------
    try:
        vmem_cap = int(pltpu.get_tpu_info().vmem_capacity_bytes)
    except Exception:
        vmem_cap = 64 * 1024 * 1024    # conservative fallback (v7x per-TC size)
    frac = 0.70 if vmem_cap <= (64 << 20) else 0.78
    budget = int(vmem_cap * frac) - (6 << 20)   # headroom for compiler scratch

    sub = {1: 32, 2: 16}.get(out_bytes, 8)      # output-dtype sublane packing

    def vmem_bytes(tm, te, wbuf):
        wgt = wbuf * ((Ckk * F_p + F_p * te) * 2 + (F_p + te) * 4)
        stream = 2 * tm * Ckk * 2 + 2 * tm * te * out_bytes   # dbl-buffered tiles
        scratch = tm * F_p * 2                                # bf16 feat scratch
        interm = tm * (F_p + te) * 4                          # f32 matmul results
        return wgt + stream + scratch + interm

    def best_tm(te, step):
        wgt = (Ckk * F_p + F_p * te) * 2 + (F_p + te) * 4     # 1-buffered weights
        per_row = 2 * Ckk * 2 + 2 * te * out_bytes + F_p * 2 + (F_p + te) * 4
        avail = budget - wgt
        if avail < step * per_row:
            return None
        tm = min(tm_max, avail // per_row)
        return max(step, tm // step * step)

    te = E_out
    tm = best_tm(te, 256)
    # Large resident weights: shrink the E tile (extra grid axis) before TM.
    while tm is None and te > 128 and te % 128 == 0:
        te = _round_up(max(128, te // 2), 128)
        tm = best_tm(te, 256)
    if tm is None:
        tm = best_tm(te, sub) or sub

    # Sublane-packed TM; ensure >= 2 row-grid steps so v7x megacore is busy.
    tm = max(sub, tm // sub * sub)
    if tm >= M and M > sub:
        tm = max(sub, _round_up(_cdiv(M, 2), sub))
    tm = min(tm, _round_up(M, sub))
    gm = _cdiv(M, tm)
    ge = _cdiv(E_out, te)

    # --- small padded weight / bias operands (resident in VMEM) ----------------
    wc_p = jnp.zeros((Ckk, F_p), jnp.bfloat16).at[:, :F].set(wc.astype(jnp.bfloat16))
    bc_p = jnp.zeros((1, F_p), jnp.float32).at[:, :F].set(
        conv_b.reshape(1, F).astype(jnp.float32))
    wp_p = jnp.zeros((F_p, E_out), jnp.bfloat16).at[:F, :E].set(wp.astype(jnp.bfloat16))
    bp_p = jnp.zeros((1, E_out), jnp.float32).at[:, :E].set(
        proj_b.reshape(1, E).astype(jnp.float32))

    # Conservative limit (covers the double-buffered-weights fallback path).
    need = vmem_bytes(tm, te, wbuf=2)
    vmem_limit = int(max(32 << 20, min(int(vmem_cap * 0.92), need + (8 << 20))))

    flops = 2 * M * (Ckk * F_p + F_p * E_out)
    bytes_accessed = int(M * Ckk * 2 + (Ckk * F_p + F_p * E_out) * 2
                         + (F_p + E_out) * 4 + M * E_out * out_bytes)

    def _build(use_buffered):
        def const(active):
            if use_buffered and active:
                return {"pipeline_mode": pl.Buffered(1)}   # fetched once, 1 buffer
            return {}
        in_specs = [
            pl.BlockSpec((tm, Ckk), lambda i, j: (i, 0)),             # streamed
            pl.BlockSpec((Ckk, F_p), lambda i, j: (0, 0), **const(True)),
            pl.BlockSpec((1, F_p), lambda i, j: (0, 0), **const(True)),
            pl.BlockSpec((F_p, te), lambda i, j: (0, j), **const(ge == 1)),
            pl.BlockSpec((1, te), lambda i, j: (0, j), **const(ge == 1)),
        ]
        return pl.pallas_call(
            hybrid_embed_kernel,
            out_shape=jax.ShapeDtypeStruct((M, E_out), out_dtype),
            grid=(gm, ge),
            in_specs=in_specs,
            out_specs=pl.BlockSpec((tm, te), lambda i, j: (i, j)),
            scratch_shapes=[pltpu.VMEM((tm, F_p), jnp.bfloat16)],
            compiler_params=pltpu.CompilerParams(
                dimension_semantics=("parallel", "arbitrary"),
                vmem_limit_bytes=vmem_limit),
            cost_estimate=pl.CostEstimate(flops=flops, transcendentals=0,
                                          bytes_accessed=bytes_accessed),
        )

    try:
        out = _build(True)(patches, wc_p, bc_p, wp_p, bp_p)
    except Exception:
        # pl.Buffered(1) not supported on this jax version -> default buffering.
        out = _build(False)(patches, wc_p, bc_p, wp_p, bp_p)

    if E_out != E:
        out = out[:, :E]
    # (B*N, E) -> (B, N, E) matches flatten(2).transpose(1, 2) ordering.
    return out.reshape(B, N, E)


def _reference(x, conv_w, conv_b, proj_w, proj_b, *, k):
    # Independent f32 reference via lax conv (NCHW / OIHW), same semantics as
    # the PyTorch module with the synthetic backbone.
    feat = lax.conv_general_dilated(
        x, conv_w, window_strides=(k, k), padding="VALID",
        dimension_numbers=("NCHW", "OIHW", "NCHW"))
    feat = jnp.maximum(feat + conv_b[None, :, None, None], 0.0)   # (B,F,Hf,Wf)
    B, F, Hf, Wf = feat.shape
    seq = feat.reshape(B, F, Hf * Wf).transpose(0, 2, 1)          # (B,N,F)
    return seq @ proj_w.T + proj_b                                # (B,N,E)


if __name__ == "__main__":
    # Small shapes: batch=2, in_chans=4, img=16x16, stride=4 -> 4x4 feature map
    # (num_patches=16), feature_dim=16, embed_dim=32.  With these sizes the
    # row grid has 2 steps, exercising the pipelined / megacore path.
    B, C, H, W = 2, 4, 16, 16
    k, F, E = 4, 16, 32

    key = jax.random.PRNGKey(0)
    kx, kcw, kcb, kpw, kpb = jax.random.split(key, 5)
    x = jax.random.normal(kx, (B, C, H, W), dtype=jnp.float32)
    conv_w = jax.random.normal(kcw, (F, C, k, k), dtype=jnp.float32) * 0.1
    conv_b = jax.random.normal(kcb, (F,), dtype=jnp.float32) * 0.1
    proj_w = jax.random.normal(kpw, (E, F), dtype=jnp.float32) * 0.1
    proj_b = jax.random.normal(kpb, (E,), dtype=jnp.float32) * 0.1

    out = hybrid_embed(x, conv_w, conv_b, proj_w, proj_b, k=k)
    out = jax.block_until_ready(out)

    ref = _reference(x, conv_w, conv_b, proj_w, proj_b, k=k)
    assert out.shape == (B, (H // k) * (W // k), E), out.shape
    # bf16 streamed operands / bf16 feat scratch -> relaxed tolerance vs f32 ref.
    assert jnp.allclose(out, ref, atol=3e-2, rtol=3e-2), "mismatch vs reference"

    print("KERNEL_OK")
</pallas_src>

<mosaic_0001>
module attributes {stable_mosaic.version = 11 : i64} {
  func.func @hybrid_embed_kernel(%arg0: i32, %arg1: i32, %arg2: memref<16x64xbf16, #tpu.memory_space<vmem>>, %arg3: memref<64x128xbf16, #tpu.memory_space<vmem>>, %arg4: memref<1x128xf32, #tpu.memory_space<vmem>>, %arg5: memref<128x32xbf16, #tpu.memory_space<vmem>>, %arg6: memref<1x32xf32, #tpu.memory_space<vmem>>, %arg7: memref<16x32xf32, #tpu.memory_space<vmem>>, %arg8: memref<16x128xbf16, #tpu.memory_space<vmem>>) attributes {dimension_semantics = [#tpu.dimension_semantics<parallel>, #tpu.dimension_semantics<arbitrary>], iteration_bounds = array<i64: 2, 1>, scalar_prefetch = 0 : i64, scratch_operands = 1 : i64, tpu.core_type = #tpu.core_type<tc>, window_params = [{transform_indices = @transform_0, window_bounds = array<i64: 16, 64>}, {pipeline_mode = #tpu.pipeline_mode<synchronous>, transform_indices = @transform_1, window_bounds = array<i64: 64, 128>}, {pipeline_mode = #tpu.pipeline_mode<synchronous>, transform_indices = @transform_2, window_bounds = array<i64: 1, 128>}, {pipeline_mode = #tpu.pipeline_mode<synchronous>, transform_indices = @transform_3, window_bounds = array<i64: 128, 32>}, {pipeline_mode = #tpu.pipeline_mode<synchronous>, transform_indices = @transform_4, window_bounds = array<i64: 1, 32>}, {transform_indices = @transform_5, window_bounds = array<i64: 16, 32>}]} {
    %c0_i32 = arith.constant 0 : i32
    %0 = arith.cmpi eq, %arg1, %c0_i32 : i32
    %1 = arith.extui %0 : i1 to i32
    %c0_i32_0 = arith.constant 0 : i32
    %2 = arith.cmpi ne, %1, %c0_i32_0 : i32
    scf.if %2 {
      %c0_8 = arith.constant 0 : index
      %c0_9 = arith.constant 0 : index
      %10 = vector.load %arg2[%c0_8, %c0_9] : memref<16x64xbf16, #tpu.memory_space<vmem>>, vector<16x64xbf16>
      %c0_10 = arith.constant 0 : index
      %c0_11 = arith.constant 0 : index
      %11 = vector.load %arg3[%c0_10, %c0_11] : memref<64x128xbf16, #tpu.memory_space<vmem>>, vector<64x128xbf16>
      %cst_12 = arith.constant dense<0.000000e+00> : vector<16x128xf32>
      %12 = tpu.matmul %10, %11, %cst_12 {dimension_numbers = #tpu.dot_dimension_numbers<[1], [0], [0], [1], [0, 0, 1, 1], [], []>} : vector<16x64xbf16>, vector<64x128xbf16>, vector<16x128xf32> -> vector<16x128xf32>
      %c0_13 = arith.constant 0 : index
      %c0_14 = arith.constant 0 : index
      %13 = vector.load %arg4[%c0_13, %c0_14] : memref<1x128xf32, #tpu.memory_space<vmem>>, vector<1x128xf32>
      %14 = vector.broadcast %13 : vector<1x128xf32> to vector<16x128xf32>
      %15 = arith.addf %12, %14 : vector<16x128xf32>
      %cst_15 = arith.constant 0.000000e+00 : f32
      %16 = vector.broadcast %cst_15 : f32 to vector<16x128xf32>
      %17 = arith.maximumf %15, %16 : vector<16x128xf32>
      %18 = arith.truncf %17 : vector<16x128xf32> to vector<16x128xbf16>
      %c0_16 = arith.constant 0 : index
      %c0_17 = arith.constant 0 : index
      %19 = vector.load %arg8[%c0_16, %c0_17] : memref<16x128xbf16, #tpu.memory_space<vmem>>, vector<16x128xbf16>
      tpu.vector_store %arg8[%c0_16, %c0_17], %18 {strides = array<i32>} : memref<16x128xbf16, #tpu.memory_space<vmem>>, vector<16x128xbf16>,
    } else {
    }
    %c0 = arith.constant 0 : index
    %c0_1 = arith.constant 0 : index
    %3 = vector.load %arg8[%c0, %c0_1] : memref<16x128xbf16, #tpu.memory_space<vmem>>, vector<16x128xbf16>
    %c0_2 = arith.constant 0 : index
    %c0_3 = arith.constant 0 : index
    %4 = vector.load %arg5[%c0_2, %c0_3] : memref<128x32xbf16, #tpu.memory_space<vmem>>, vector<128x32xbf16>
    %cst = arith.constant dense<0.000000e+00> : vector<16x32xf32>
    %5 = tpu.matmul %3, %4, %cst {dimension_numbers = #tpu.dot_dimension_numbers<[1], [0], [0], [1], [0, 0, 1, 1], [], []>} : vector<16x128xbf16>, vector<128x32xbf16>, vector<16x32xf32> -> vector<16x32xf32>
    %c0_4 = arith.constant 0 : index
    %c0_5 = arith.constant 0 : index
    %6 = vector.load %arg6[%c0_4, %c0_5] : memref<1x32xf32, #tpu.memory_space<vmem>>, vector<1x32xf32>
    %7 = vector.broadcast %6 : vector<1x32xf32> to vector<16x32xf32>
    %8 = arith.addf %5, %7 : vector<16x32xf32>
    %c0_6 = arith.constant 0 : index
    %c0_7 = arith.constant 0 : index
    %9 = vector.load %arg7[%c0_6, %c0_7] : memref<16x32xf32, #tpu.memory_space<vmem>>, vector<16x32xf32>
    tpu.vector_store %arg7[%c0_6, %c0_7], %8 {strides = array<i32>} : memref<16x32xf32, #tpu.memory_space<vmem>>, vector<16x32xf32>,
    return
  }
  func.func @transform_0(%arg0: i32, %arg1: i32) -> (i32, i32) {
    %c0_i32 = arith.constant 0 : i32
    %c0_i32_0 = arith.constant 0 : i32
    return %arg0, %c0_i32 : i32, i32
  }
  func.func @transform_1(%arg0: i32, %arg1: i32) -> (i32, i32) {
    %c0_i32 = arith.constant 0 : i32
    %c0_i32_0 = arith.constant 0 : i32
    %c0_i32_1 = arith.constant 0 : i32
    return %c0_i32, %c0_i32_0 : i32, i32
  }
  func.func @transform_2(%arg0: i32, %arg1: i32) -> (i32, i32) {
    %c0_i32 = arith.constant 0 : i32
    %c0_i32_0 = arith.constant 0 : i32
    %c0_i32_1 = arith.constant 0 : i32
    return %c0_i32, %c0_i32_0 : i32, i32
  }
  func.func @transform_3(%arg0: i32, %arg1: i32) -> (i32, i32) {
    %c0_i32 = arith.constant 0 : i32
    %c0_i32_0 = arith.constant 0 : i32
    return %c0_i32, %arg1 : i32, i32
  }
  func.func @transform_4(%arg0: i32, %arg1: i32) -> (i32, i32) {
    %c0_i32 = arith.constant 0 : i32
    %c0_i32_0 = arith.constant 0 : i32
    return %c0_i32, %arg1 : i32, i32
  }
  func.func @transform_5(%arg0: i32, %arg1: i32) -> (i32, i32) {
    %c0_i32 = arith.constant 0 : i32
    return %arg0, %arg1 : i32, i32
  }
}

module attributes {stable_mosaic.version = 11 : i64} {
  func.func @hybrid_embed_kernel(%arg0: i32, %arg1: i32, %arg2: memref<16x64xbf16, #tpu.memory_space<vmem>>, %arg3: memref<64x128xbf16, #tpu.memory_space<vmem>>, %arg4: memref<1x128xf32, #tpu.memory_space<vmem>>, %arg5: memref<128x32xbf16, #tpu.memory_space<vmem>>, %arg6: memref<1x32xf32, #tpu.memory_space<vmem>>, %arg7: memref<16x32xf32, #tpu.memory_space<vmem>>, %arg8: memref<16x128xbf16, #tpu.memory_space<vmem>>) attributes {dimension_semantics = [#tpu.dimension_semantics<parallel>, #tpu.dimension_semantics<arbitrary>], iteration_bounds = array<i64: 2, 1>, scalar_prefetch = 0 : i64, scratch_operands = 1 : i64, tpu.core_type = #tpu.core_type<tc>, window_params = [{transform_indices = @transform_0, window_bounds = array<i64: 16, 64>}, {pipeline_mode = #tpu.pipeline_mode<synchronous>, transform_indices = @transform_1, window_bounds = array<i64: 64, 128>}, {pipeline_mode = #tpu.pipeline_mode<synchronous>, transform_indices = @transform_2, window_bounds = array<i64: 1, 128>}, {transform_indices = @transform_3, window_bounds = array<i64: 128, 32>}, {transform_indices = @transform_4, window_bounds = array<i64: 1, 32>}, {transform_indices = @transform_5, window_bounds = array<i64: 16, 32>}]} {
    %c0_i32 = arith.constant 0 : i32
    %0 = arith.cmpi eq, %arg1, %c0_i32 : i32
    %1 = arith.extui %0 : i1 to i32
    %c0_i32_0 = arith.constant 0 : i32
    %2 = arith.cmpi ne, %1, %c0_i32_0 : i32
    scf.if %2 {
      %c0_8 = arith.constant 0 : index
      %c0_9 = arith.constant 0 : index
      %10 = vector.load %arg2[%c0_8, %c0_9] : memref<16x64xbf16, #tpu.memory_space<vmem>>, vector<16x64xbf16>
      %c0_10 = arith.constant 0 : index
      %c0_11 = arith.constant 0 : index
      %11 = vector.load %arg3[%c0_10, %c0_11] : memref<64x128xbf16, #tpu.memory_space<vmem>>, vector<64x128xbf16>
      %cst_12 = arith.constant dense<0.000000e+00> : vector<16x128xf32>
      %12 = tpu.matmul %10, %11, %cst_12 {dimension_numbers = #tpu.dot_dimension_numbers<[1], [0], [0], [1], [0, 0, 1, 1], [], []>} : vector<16x64xbf16>, vector<64x128xbf16>, vector<16x128xf32> -> vector<16x128xf32>
      %c0_13 = arith.constant 0 : index
      %c0_14 = arith.constant 0 : index
      %13 = vector.load %arg4[%c0_13, %c0_14] : memref<1x128xf32, #tpu.memory_space<vmem>>, vector<1x128xf32>
      %14 = vector.broadcast %13 : vector<1x128xf32> to vector<16x128xf32>
      %15 = arith.addf %12, %14 : vector<16x128xf32>
      %cst_15 = arith.constant 0.000000e+00 : f32
      %16 = vector.broadcast %cst_15 : f32 to vector<16x128xf32>
      %17 = arith.maximumf %15, %16 : vector<16x128xf32>
      %18 = arith.truncf %17 : vector<16x128xf32> to vector<16x128xbf16>
      %c0_16 = arith.constant 0 : index
      %c0_17 = arith.constant 0 : index
      %19 = vector.load %arg8[%c0_16, %c0_17] : memref<16x128xbf16, #tpu.memory_space<vmem>>, vector<16x128xbf16>
      tpu.vector_store %arg8[%c0_16, %c0_17], %18 {strides = array<i32>} : memref<16x128xbf16, #tpu.memory_space<vmem>>, vector<16x128xbf16>,
    } else {
    }
    %c0 = arith.constant 0 : index
    %c0_1 = arith.constant 0 : index
    %3 = vector.load %arg8[%c0, %c0_1] : memref<16x128xbf16, #tpu.memory_space<vmem>>, vector<16x128xbf16>
    %c0_2 = arith.constant 0 : index
    %c0_3 = arith.constant 0 : index
    %4 = vector.load %arg5[%c0_2, %c0_3] : memref<128x32xbf16, #tpu.memory_space<vmem>>, vector<128x32xbf16>
    %cst = arith.constant dense<0.000000e+00> : vector<16x32xf32>
    %5 = tpu.matmul %3, %4, %cst {dimension_numbers = #tpu.dot_dimension_numbers<[1], [0], [0], [1], [0, 0, 1, 1], [], []>} : vector<16x128xbf16>, vector<128x32xbf16>, vector<16x32xf32> -> vector<16x32xf32>
    %c0_4 = arith.constant 0 : index
    %c0_5 = arith.constant 0 : index
    %6 = vector.load %arg6[%c0_4, %c0_5] : memref<1x32xf32, #tpu.memory_space<vmem>>, vector<1x32xf32>
    %7 = vector.broadcast %6 : vector<1x32xf32> to vector<16x32xf32>
    %8 = arith.addf %5, %7 : vector<16x32xf32>
    %c0_6 = arith.constant 0 : index
    %c0_7 = arith.constant 0 : index
    %9 = vector.load %arg7[%c0_6, %c0_7] : memref<16x32xf32, #tpu.memory_space<vmem>>, vector<16x32xf32>
    tpu.vector_store %arg7[%c0_6, %c0_7], %8 {strides = array<i32>} : memref<16x32xf32, #tpu.memory_space<vmem>>, vector<16x32xf32>,
    return
  }
  func.func @transform_0(%arg0: i32, %arg1: i32) -> (i32, i32) {
    %c0_i32 = arith.constant 0 : i32
    %c0_i32_0 = arith.constant 0 : i32
    return %arg0, %c0_i32 : i32, i32
  }
  func.func @transform_1(%arg0: i32, %arg1: i32) -> (i32, i32) {
    %c0_i32 = arith.constant 0 : i32
    %c0_i32_0 = arith.constant 0 : i32
    %c0_i32_1 = arith.constant 0 : i32
    return %c0_i32, %c0_i32_0 : i32, i32
  }
  func.func @transform_2(%arg0: i32, %arg1: i32) -> (i32, i32) {
    %c0_i32 = arith.constant 0 : i32
    %c0_i32_0 = arith.constant 0 : i32
    %c0_i32_1 = arith.constant 0 : i32
    return %c0_i32, %c0_i32_0 : i32, i32
  }
  func.func @transform_3(%arg0: i32, %arg1: i32) -> (i32, i32) {
    %c0_i32 = arith.constant 0 : i32
    %c0_i32_0 = arith.constant 0 : i32
    return %c0_i32, %arg1 : i32, i32
  }
  func.func @transform_4(%arg0: i32, %arg1: i32) -> (i32, i32) {
    %c0_i32 = arith.constant 0 : i32
    %c0_i32_0 = arith.constant 0 : i32
    return %c0_i32, %arg1 : i32, i32
  }
  func.func @transform_5(%arg0: i32, %arg1: i32) -> (i32, i32) {
    %c0_i32 = arith.constant 0 : i32
    return %arg0, %arg1 : i32, i32
  }
}

</mosaic_0001>

<bundles_post_ra>
// kernel: tpu_custom_call.1
= control target key start
LH: loop header
LB: loop body
LE: loop exit
PB: predicated region body
PF: predicated region fallthrough
CT: control target
= control target key end

     0   :  { %10 = vsyncpa [#allocation4], 0  ;;  %s953_s0 = inlined_call_operand.vmem [shape: bf16[32,64], index: 0, kind: input, shape index: {}]   ;;  %s954_s1 = inlined_call_operand.vmem [shape: bf16[64,128], index: 1, kind: input, shape index: {}]   ;;  %s955_s2 = inlined_call_operand.vmem [shape: f32[1,128], index: 2, kind: input, shape index: {}]   ;;  %s956_s3 = inlined_call_operand.vmem [shape: bf16[128,32], index: 3, kind: input, shape index: {}]   ;;  %s957_s4 = inlined_call_operand.vmem [shape: f32[1,32], index: 4, kind: input, shape index: {}]   ;;  %s958_s5 = inlined_call_operand.hbm [shape: f32[32,32], index: 5, kind: output, shape index: {}]  }
   0x1   :  { %12 = vsyncpa [#allocation4 + $0x1], 0  ;;  %s815_s18 = smov 0   ;;  %s817_s19 = smov 0  }
   0x2   :  { %s819_s20 = smov 0   ;;  %s821_s21 = smov 0  }
   0x3   :  { %s823_s22 = smov 0   ;;  %s825_s23 = smov 0  }
   0x4 LB: > { %s552_s24 = sadd.s32 4294967295, %s781_s23   ;;  %s553_s25 = sadd.s32 4294967294, %s781_s23   ;;  %s781_s23 = sphi %s825_s23, %s18_s23   ;;  %s777_s22 = sphi %s823_s22, %s965_s22   ;;  %s773_s21 = sphi %s821_s21, %s964_s21   ;;  %s769_s20 = sphi %s819_s20, %s963_s20   ;;  %s765_s19 = sphi %s817_s19, %s962_s19   ;;  %s761_s18 = sphi %s815_s18, %s961_s18  }
   0x5   : > { %s30_s26 = sadd.s32 1, %s777_s22  ;;  %s159_s27 = sadd.s32 1, %s769_s20 }
   0x6   : > { %p32_p0 = scmp.ge.s32.totalorder %s30_s26, 2  ;;  %p169_p1 = scmp.ne.s32.totalorder %s769_s20, %s765_s19 }
   0x7   : > { %p170_p2 = scmp.eq.s32.totalorder %s552_s24, 1  ;;  %p175_p3 = scmp.ne.s32.totalorder %s765_s19, %s761_s18 }
   0x8   : > { %s967_s26 = smov (%p32_p0, %s30_s26), 0  ;;  %p176_p5 = scmp.eq.s32.totalorder %s553_s25, 1 }
   0x9   : > { %p855_p4 = por %p170_p2, %p169_p1  ;;  %s154_s29 = ssub.s32 %s777_s22, %s967_s26 }
   0xa   : > { %p558_p6 = scmp.ge.s32.totalorder %s781_s23, 1  ;;  %p157_p7 = scmp.eq.s32.totalorder %s154_s29, 0 }
   0xb   : > { %p862_p8 = por %p176_p5, %p175_p3  ;;  %p222_p9 = scmp.lt.s32.totalorder %s781_s23, 3 }
   0xc   : > { %s868_s6 = scalar_select %p157_p7, %s769_s20, %s159_s27  }
   0xd   : > { %p223_p10 = pnand %p558_p6, %p222_p9 }
   0xe   : > { %s560_s9 = sshll.u32 (!%p223_p10), %s773_s21, 1  ;;  %s638_s12 = sshll.u32 (!%p223_p10), %s773_s21, 4 }
   0xf   : > { %226 = sbr.rel (%p223_p10) target bundleno = 324 (0x144), region = 40  ;;  %p258_p11 = scmp.lt.s32.totalorder (!%p223_p10), %s560_s9, 3 }
  0x10   : > { %s449_s15 = scalar_lea.hbm (!%p223_p10), %s958_s5, %s638_s12 }
  0x14   : > { %v628_v0 = vld [vmem:[%s954_s1 + $0x18] sm:$0xff]  ;;  %v627_v2 = vld [vmem:[%s954_s1 + $0x10] sm:$0xff]  ;;  %s969_s9 = smov (!%p258_p11, %s560_s9), 3  ;;  %v626_v4 = vld [vmem:[%s954_s1 + $0x8] sm:$0xff]  ;;  %vm319_vm0 = vcmask 523264   ;;  %vm433_vm1 = vcmask 261120  }
  0x15   : > { %v637_v1 = vld [vmem:[%s956_s3 + $0x38] sm:$0xff]  ;;  %327 = vmatpush.bf16.msra.mxu0 %v628_v0  ;;  %v636_v3 = vld [vmem:[%s956_s3 + $0x30] sm:$0xff]  ;;  %s561_s24 = sshll.u32 %s969_s9, 2  ;;  %v625_v5 = vld [vmem:[%s954_s1] sm:$0xff] }
  0x16   : > { %419 = vmatpush.bf16.msra.mxu1 %v637_v1  ;;  %s261_s8 = scalar_lea.vmem %s953_s0, %s561_s24  ;;  %v635_v7 = vld [vmem:[%s956_s3 + $0x28] sm:$0xff]  ;;  %v634_v8 = vld [vmem:[%s956_s3 + $0x20] sm:$0xff]  ;;  %v633_v9 = vld [vmem:[%s956_s3 + $0x18] sm:$0xff]  ;;  %s452_s24 = sshll.u32 %s449_s15, 4  ;;  %s453_s24 = int_to_ptr.hbm [resolvable:$true] %s452_s24 }
  0x17   : > { %v624_v6 = vld [vmem:[%s261_s8] sm:$0xff]  ;;  %v632_v10 = vld [vmem:[%s956_s3 + $0x10] sm:$0xff]  ;;  %v631_v11 = vld [vmem:[%s956_s3 + $0x8] sm:$0xff]  ;;  %s254_s8 = sand.u32 1, %s765_s19   ;;  %s717_s27 = sshra.s32 %s453_s24, 4  ;;  %s718_s27 = int_to_ptr.hbm [resolvable:$true] %s717_s27 }
  0x18   : > { %v630_v12 = vld [vmem:[%s956_s3] sm:$0xff]  ;;  %s559_s10 = sshll.u32 %s254_s8, 4  ;;  %s437_s25 = scalar_lea.sflag [#allocation4], %s254_s8 }
  0x19   : > { %328 = vmatpush.bf16.msra.mxu0 %v627_v2  ;;  %v701_v14 = vld [vmem:[%s955_s2] ss:$0 sm:$0xff]  ;;  %s256_s16 = scalar_lea.vmem [#allocation3], %s559_s10  ;;  %s719_s21 = scalar_lea.hbm %s718_s27, 16 }
  0x1a   : > { %420 = vmatpush.bf16.msra.mxu1 %v636_v3  ;;  %v702_v22 = vld [vmem:[%s957_s4] ss:$0 sm:$0xff]  ;;  %s450_s17 = sshll.u32 %s256_s16, 4  ;;  %p720_p12 = scmp.ne.s32.totalorder %s718_s27, %s719_s21  ;;  %s451_s17 = int_to_ptr.vmem [resolvable:$true] %s450_s17 }
  0x1b   : > { %s723_s10 = scalar_lea.hbm %s958_s5, 32  ;;  %p724_p1 = scmp.lt.s32.totalorder %s718_s27, %s958_s5 }
  0x1c   : > { %p721_p13 = pnand %p720_p12, %p855_p4  ;;  %p725_p2 = scmp.lt.s32.totalorder %s723_s10, %s719_s21 }
  0x1d   : > { %329 = vmatpush.bf16.msra.mxu0 %v626_v4 }
  0x1e   : > { %421 = vmatpush.bf16.msra.mxu1 %v635_v7  ;;  %p722_p0 = pneg %p721_p13  ;;  %p726_p3 = por %p725_p2, %p724_p1 }
  0x20   : > { %p727_p5 = pnand %p726_p3, %p722_p0 }
  0x21   : > { %330 = vmatpush.bf16.msra.mxu0 %v625_v5 }
  0x22   : > { %422 = vmatpush.bf16.msra.mxu1 %v634_v8 }
  0x24   : > { %582 = vmatmul.msk.bf16.vlgmr.msra.gmra.mxu0 %vm319_vm0, %v624_v6 }
  0x26   : > { %423 = vmatpush.bf16.msra.mxu1 %v633_v9 }
  0x2a   : > { %424 = vmatpush.bf16.msra.mxu1 %v632_v10 }
  0x2e   : > { %425 = vmatpush.bf16.msra.mxu1 %v631_v11 }
  0x32   : > { %426 = vmatpush.bf16.msra.mxu1 %v630_v12 }
  0xa1   : > { %v332_v13 = vpop.f32.mrf.mxu0 }
  0xa2   : > { %v333_v15 = vadd.f32 %v701_v14, %v332_v13 }
  0xa4   : > { %v337_v18 = vmax.f32 %v333_v15, 0.0 }
  0xa9   : > { %v334_v16 = vpop.f32.mrf.mxu0 }
  0xaa   : > { %v335_v17 = vadd.f32 %v701_v14, %v334_v16 }
  0xac   : > { %v338_v19 = vmax.f32 %v335_v17, 0.0 }
  0xae   : > { %v642_v20 = vpack.c.bf16 %v338_v19, %v337_v18 }
  0xb0   : > { %643 = vst [vmem:[#allocation2] sm:$0xff] %v642_v20  }
  0xb7   : > { %v629_v21 = vld [vmem:[#allocation2] sm:$0xff] }
  0xb8   : > { %427 = vmatmul.bf16.vlgmr.msra.gmra.mxu1 %v629_v21 }
 0x135   : > { %v428_v23 = vpop.f32.mrf.mxu1 }
 0x136   : > { %v429_v24 = vadd.f32 %v702_v22, %v428_v23 }
 0x138   : > { %434 = vst.msk [vmem:[%s256_s16] sm:$0xff] %vm433_vm1, %v429_v24 }
 0x13d   : > { %v430_v25 = vpop.f32.mrf.mxu1 }
 0x13e   : > { %v431_v26 = vadd.f32 %v702_v22, %v430_v25 }
 0x140   : > { %435 = vst.msk [vmem:[%s256_s16 + $0x8] sm:$0xff] %vm433_vm1, %v431_v26 }
 0x141   : > { %730 = shalt.err (!%p727_p5)
}
 0x142   : > { %s783_s8 = smov 128   ;;  %s784_s12 = smov 8  }
 0x143   : > { %644 = dma.vmem_to_hbm [thread:$0]  (%p855_p4), %s451_s17, 256, %s453_s24, %s437_s25, %s783_s8, %s783_s8, %s784_s12  }
 0x144 PF: > { %p650_p6 = scmp.ge.s32.totalorder %s781_s23, 2  ;;  %s467_s13 = sand.u32 1, %s761_s18  }
 0x145   : > { %s468_s14 = scalar_lea.sflag [#allocation4], %s467_s13 }
 0x146   : > { %p647_p7 = pnand %p650_p6, %p862_p8 }
 0x148   : > { %p648_p9 = pneg %p647_p7 }
 0x14a   : > { %756 = dma.done.wait (%p648_p9), %s468_s14, 256  }
 0x14b   : > { %758 = vsyncadd (%p648_p9), %s468_s14, 4294967040  ;;  %s18_s23 = sadd.s32 1, %s781_s23   ;;  %s961_s18 = smov %s765_s19 }
 0x14c   : > { %p15_p10 = scmp.ge.s32.totalorder %s18_s23, 4   ;;  %s962_s19 = smov %s769_s20 }
 0x14d   : > { %s963_s20 = smov %s868_s6  ;;  %s964_s21 = smov %s777_s22 }
 0x14e   : > { %s965_s22 = smov %s967_s26  ;;  %17 = sbr.rel (!%p15_p10) target bundleno = 4 (0x4), region = 85 }
 0x153   :  { %474 = vsyncpa [#allocation4], 1 }
 0x154   :  { %476 = vsyncpa [#allocation4 + $0x1], 1 }

// kernel: tpu_custom_call.1
= control target key start
LH: loop header
LB: loop body
LE: loop exit
PB: predicated region body
PF: predicated region fallthrough
CT: control target
= control target key end

     0   :  { %10 = vsyncpa [#allocation4], 0  ;;  %s953_s0 = inlined_call_operand.vmem [shape: bf16[32,64], index: 0, kind: input, shape index: {}]   ;;  %s954_s1 = inlined_call_operand.vmem [shape: bf16[64,128], index: 1, kind: input, shape index: {}]   ;;  %s955_s2 = inlined_call_operand.vmem [shape: f32[1,128], index: 2, kind: input, shape index: {}]   ;;  %s956_s3 = inlined_call_operand.vmem [shape: bf16[128,32], index: 3, kind: input, shape index: {}]   ;;  %s957_s4 = inlined_call_operand.vmem [shape: f32[1,32], index: 4, kind: input, shape index: {}]   ;;  %s958_s5 = inlined_call_operand.hbm [shape: f32[32,32], index: 5, kind: output, shape index: {}]  }
   0x1   :  { %12 = vsyncpa [#allocation4 + $0x1], 0  ;;  %s815_s18 = smov 0   ;;  %s817_s19 = smov 0  }
   0x2   :  { %s819_s20 = smov 0   ;;  %s821_s21 = smov 0  }
   0x3   :  { %s823_s22 = smov 0   ;;  %s825_s23 = smov 0  }
   0x4 LB: > { %s552_s24 = sadd.s32 4294967295, %s781_s23   ;;  %s553_s25 = sadd.s32 4294967294, %s781_s23   ;;  %s781_s23 = sphi %s825_s23, %s18_s23   ;;  %s777_s22 = sphi %s823_s22, %s965_s22   ;;  %s773_s21 = sphi %s821_s21, %s964_s21   ;;  %s769_s20 = sphi %s819_s20, %s963_s20   ;;  %s765_s19 = sphi %s817_s19, %s962_s19   ;;  %s761_s18 = sphi %s815_s18, %s961_s18  }
   0x5   : > { %s30_s26 = sadd.s32 1, %s777_s22  ;;  %s159_s27 = sadd.s32 1, %s769_s20 }
   0x6   : > { %p32_p0 = scmp.ge.s32.totalorder %s30_s26, 2  ;;  %p169_p1 = scmp.ne.s32.totalorder %s769_s20, %s765_s19 }
   0x7   : > { %p170_p2 = scmp.eq.s32.totalorder %s552_s24, 1  ;;  %p175_p3 = scmp.ne.s32.totalorder %s765_s19, %s761_s18 }
   0x8   : > { %s967_s26 = smov (%p32_p0, %s30_s26), 0  ;;  %p176_p5 = scmp.eq.s32.totalorder %s553_s25, 1 }
   0x9   : > { %p855_p4 = por %p170_p2, %p169_p1  ;;  %s154_s29 = ssub.s32 %s777_s22, %s967_s26 }
   0xa   : > { %p558_p6 = scmp.ge.s32.totalorder %s781_s23, 1  ;;  %p157_p7 = scmp.eq.s32.totalorder %s154_s29, 0 }
   0xb   : > { %p862_p8 = por %p176_p5, %p175_p3  ;;  %p222_p9 = scmp.lt.s32.totalorder %s781_s23, 3 }
   0xc   : > { %s868_s6 = scalar_select %p157_p7, %s769_s20, %s159_s27  }
   0xd   : > { %p223_p10 = pnand %p558_p6, %p222_p9 }
   0xe   : > { %s560_s9 = sshll.u32 (!%p223_p10), %s773_s21, 1  ;;  %s638_s12 = sshll.u32 (!%p223_p10), %s773_s21, 4 }
   0xf   : > { %226 = sbr.rel (%p223_p10) target bundleno = 324 (0x144), region = 40  ;;  %p258_p11 = scmp.lt.s32.totalorder (!%p223_p10), %s560_s9, 3 }
  0x10   : > { %s449_s15 = scalar_lea.hbm (!%p223_p10), %s958_s5, %s638_s12 }
  0x14   : > { %v628_v0 = vld [vmem:[%s954_s1 + $0x18] sm:$0xff]  ;;  %v627_v2 = vld [vmem:[%s954_s1 + $0x10] sm:$0xff]  ;;  %s969_s9 = smov (!%p258_p11, %s560_s9), 3  ;;  %v626_v4 = vld [vmem:[%s954_s1 + $0x8] sm:$0xff]  ;;  %vm319_vm0 = vcmask 523264   ;;  %vm433_vm1 = vcmask 261120  }
  0x15   : > { %v637_v1 = vld [vmem:[%s956_s3 + $0x38] sm:$0xff]  ;;  %327 = vmatpush.bf16.msra.mxu0 %v628_v0  ;;  %v636_v3 = vld [vmem:[%s956_s3 + $0x30] sm:$0xff]  ;;  %s561_s24 = sshll.u32 %s969_s9, 2  ;;  %v625_v5 = vld [vmem:[%s954_s1] sm:$0xff] }
  0x16   : > { %419 = vmatpush.bf16.msra.mxu1 %v637_v1  ;;  %s261_s8 = scalar_lea.vmem %s953_s0, %s561_s24  ;;  %v635_v7 = vld [vmem:[%s956_s3 + $0x28] sm:$0xff]  ;;  %v634_v8 = vld [vmem:[%s956_s3 + $0x20] sm:$0xff]  ;;  %v633_v9 = vld [vmem:[%s956_s3 + $0x18] sm:$0xff]  ;;  %s452_s24 = sshll.u32 %s449_s15, 4  ;;  %s453_s24 = int_to_ptr.hbm [resolvable:$true] %s452_s24 }
  0x17   : > { %v624_v6 = vld [vmem:[%s261_s8] sm:$0xff]  ;;  %v632_v10 = vld [vmem:[%s956_s3 + $0x10] sm:$0xff]  ;;  %v631_v11 = vld [vmem:[%s956_s3 + $0x8] sm:$0xff]  ;;  %s254_s8 = sand.u32 1, %s765_s19   ;;  %s717_s27 = sshra.s32 %s453_s24, 4  ;;  %s718_s27 = int_to_ptr.hbm [resolvable:$true] %s717_s27 }
  0x18   : > { %v630_v12 = vld [vmem:[%s956_s3] sm:$0xff]  ;;  %s559_s10 = sshll.u32 %s254_s8, 4  ;;  %s437_s25 = scalar_lea.sflag [#allocation4], %s254_s8 }
  0x19   : > { %328 = vmatpush.bf16.msra.mxu0 %v627_v2  ;;  %v701_v14 = vld [vmem:[%s955_s2] ss:$0 sm:$0xff]  ;;  %s256_s16 = scalar_lea.vmem [#allocation3], %s559_s10  ;;  %s719_s21 = scalar_lea.hbm %s718_s27, 16 }
  0x1a   : > { %420 = vmatpush.bf16.msra.mxu1 %v636_v3  ;;  %v702_v22 = vld [vmem:[%s957_s4] ss:$0 sm:$0xff]  ;;  %s450_s17 = sshll.u32 %s256_s16, 4  ;;  %p720_p12 = scmp.ne.s32.totalorder %s718_s27, %s719_s21  ;;  %s451_s17 = int_to_ptr.vmem [resolvable:$true] %s450_s17 }
  0x1b   : > { %s723_s10 = scalar_lea.hbm %s958_s5, 32  ;;  %p724_p1 = scmp.lt.s32.totalorder %s718_s27, %s958_s5 }
  0x1c   : > { %p721_p13 = pnand %p720_p12, %p855_p4  ;;  %p725_p2 = scmp.lt.s32.totalorder %s723_s10, %s719_s21 }
  0x1d   : > { %329 = vmatpush.bf16.msra.mxu0 %v626_v4 }
  0x1e   : > { %421 = vmatpush.bf16.msra.mxu1 %v635_v7  ;;  %p722_p0 = pneg %p721_p13  ;;  %p726_p3 = por %p725_p2, %p724_p1 }
  0x20   : > { %p727_p5 = pnand %p726_p3, %p722_p0 }
  0x21   : > { %330 = vmatpush.bf16.msra.mxu0 %v625_v5 }
  0x22   : > { %422 = vmatpush.bf16.msra.mxu1 %v634_v8 }
  0x24   : > { %582 = vmatmul.msk.bf16.vlgmr.msra.gmra.mxu0 %vm319_vm0, %v624_v6 }
  0x26   : > { %423 = vmatpush.bf16.msra.mxu1 %v633_v9 }
  0x2a   : > { %424 = vmatpush.bf16.msra.mxu1 %v632_v10 }
  0x2e   : > { %425 = vmatpush.bf16.msra.mxu1 %v631_v11 }
  0x32   : > { %426 = vmatpush.bf16.msra.mxu1 %v630_v12 }
  0xa1   : > { %v332_v13 = vpop.f32.mrf.mxu0 }
  0xa2   : > { %v333_v15 = vadd.f32 %v701_v14, %v332_v13 }
  0xa4   : > { %v337_v18 = vmax.f32 %v333_v15, 0.0 }
  0xa9   : > { %v334_v16 = vpop.f32.mrf.mxu0 }
  0xaa   : > { %v335_v17 = vadd.f32 %v701_v14, %v334_v16 }
  0xac   : > { %v338_v19 = vmax.f32 %v335_v17, 0.0 }
  0xae   : > { %v642_v20 = vpack.c.bf16 %v338_v19, %v337_v18 }
  0xb0   : > { %643 = vst [vmem:[#allocation2] sm:$0xff] %v642_v20  }
  0xb7   : > { %v629_v21 = vld [vmem:[#allocation2] sm:$0xff] }
  0xb8   : > { %427 = vmatmul.bf16.vlgmr.msra.gmra.mxu1 %v629_v21 }
 0x135   : > { %v428_v23 = vpop.f32.mrf.mxu1 }
 0x136   : > { %v429_v24 = vadd.f32 %v702_v22, %v428_v23 }
 0x138   : > { %434 = vst.msk [vmem:[%s256_s16] sm:$0xff] %vm433_vm1, %v429_v24 }
 0x13d   : > { %v430_v25 = vpop.f32.mrf.mxu1 }
 0x13e   : > { %v431_v26 = vadd.f32 %v702_v22, %v430_v25 }
 0x140   : > { %435 = vst.msk [vmem:[%s256_s16 + $0x8] sm:$0xff] %vm433_vm1, %v431_v26 }
 0x141   : > { %730 = shalt.err (!%p727_p5)
}
 0x142   : > { %s783_s8 = smov 128   ;;  %s784_s12 = smov 8  }
 0x143   : > { %644 = dma.vmem_to_hbm [thread:$0]  (%p855_p4), %s451_s17, 256, %s453_s24, %s437_s25, %s783_s8, %s783_s8, %s784_s12  }
 0x144 PF: > { %p650_p6 = scmp.ge.s32.totalorder %s781_s23, 2  ;;  %s467_s13 = sand.u32 1, %s761_s18  }
 0x145   : > { %s468_s14 = scalar_lea.sflag [#allocation4], %s467_s13 }
 0x146   : > { %p647_p7 = pnand %p650_p6, %p862_p8 }
 0x148   : > { %p648_p9 = pneg %p647_p7 }
 0x14a   : > { %756 = dma.done.wait (%p648_p9), %s468_s14, 256  }
 0x14b   : > { %758 = vsyncadd (%p648_p9), %s468_s14, 4294967040  ;;  %s18_s23 = sadd.s32 1, %s781_s23   ;;  %s961_s18 = smov %s765_s19 }
 0x14c   : > { %p15_p10 = scmp.ge.s32.totalorder %s18_s23, 4   ;;  %s962_s19 = smov %s769_s20 }
 0x14d   : > { %s963_s20 = smov %s868_s6  ;;  %s964_s21 = smov %s777_s22 }
 0x14e   : > { %s965_s22 = smov %s967_s26  ;;  %17 = sbr.rel (!%p15_p10) target bundleno = 4 (0x4), region = 85 }
 0x153   :  { %474 = vsyncpa [#allocation4], 1 }
 0x154   :  { %476 = vsyncpa [#allocation4 + $0x1], 1 }

</bundles_post_ra>
